<compile_context>
chip_gen: v7x
topology: tpu7x:2x2x1
jax: 0.10.0
libtpu: 0.0.40
codegen_flags: <defaults>
</compile_context>

<pallas_src>
import jax
import jax.numpy as jnp
from jax import lax
from jax.experimental import pallas as pl
from jax.experimental.pallas import tpu as pltpu


def _round_up(n, m):
    return (n + m - 1) // m * m


def mlp_kernel(x_ref, w1_ref, b1_ref, w2_ref, b2_ref, w3_ref, b3_ref, o_ref):
    # Layer 1 (features-major): h1T = tanh(W1 @ x^T + b1) -> (64, TB).
    # Transposed-RHS contraction ('fd,bd->fb'); bf16 inputs hit the MXU
    # natively, accumulation is f32.  Dropout1 = identity at inference.
    h1t = lax.dot_general(
        w1_ref[...], x_ref[...],
        dimension_numbers=(((1,), (1,)), ((), ())),
        preferred_element_type=jnp.float32)
    h1t = jnp.tanh(h1t + b1_ref[...])                         # f32 (64, TB)

    # Layer 2: h2T = relu(W2 @ h1T + b2) -> (32, TB).  Matmul inputs follow
    # the weight dtype (bf16 on the bf16 path); activation math stays f32.
    h2t = jnp.dot(w2_ref[...], h1t.astype(w2_ref.dtype),
                  preferred_element_type=jnp.float32)
    h2t = jnp.maximum(h2t + b2_ref[...], 0.0)                 # f32 (32, TB)

    # Layer 3: sigmoid(w3 . h2 + b3).  K=32, N=1: broadcast-multiply on the
    # VPU + sublane reduce on the XLU instead of a sliver MXU pass.  The
    # (1, TB) result is lane-dense -> unmasked stores.  Dropout2 = identity.
    h3 = jnp.sum(h2t * w3_ref[...], axis=0, keepdims=True) + b3_ref[...]
    o_ref[...] = jax.nn.sigmoid(h3).astype(o_ref.dtype)       # (1, TB)


def neural_network_forward(x, params, *, tile_batch=8192):
    """Forward pass of the MLP.

    x: (B, D), float32 or bfloat16 (bf16 halves the HBM read of the only
       large operand and feeds the MXU natively; accumulation stays f32).
    params: PyTorch-layout weights:
       w1 (64, D), b1 (64,), w2 (32, 64), b2 (32,), w3 (1, 32), b3 (1,).
    Returns (B, 1) float32.
    """
    B, D = x.shape

    # Matmul-input dtype follows x; biases / layer-3 weight stay f32.
    mat_dt = jnp.bfloat16 if x.dtype == jnp.bfloat16 else jnp.float32
    w1 = params["w1"].astype(mat_dt)                        # (64, D)
    w2 = params["w2"].astype(mat_dt)                        # (32, 64)
    b1 = params["b1"].astype(jnp.float32).reshape(-1, 1)    # (64, 1)
    b2 = params["b2"].astype(jnp.float32).reshape(-1, 1)    # (32, 1)
    w3 = params["w3"].astype(jnp.float32).reshape(-1, 1)    # (32, 1) column
    b3 = params["b3"].astype(jnp.float32).reshape(1, 1)     # (1, 1)

    # Batch tile: multiple of 128 (lane dim of the (1, tb) output block);
    # keep >= 2 grid steps when possible (v7x megacore).  The grid is ragged
    # (pl.cdiv) -- no padded copy of x.  Honest VMEM budget at tb=8192, f32:
    #   x tile 2 * tb*512 B (lane-padded, double-buffered) = 8 MiB,
    #   h1T 2 MiB + h2T 1 MiB (lane-dense), out 2 * tb*32 B = 0.5 MiB,
    #   weights ~40 KiB  ->  ~12 MiB, well under the 32 MiB limit below
    #   (fits v7x's 64 MiB physical / 32 MiB scoped VMEM too).
    tb = _round_up(min(tile_batch, max(pl.cdiv(B, 2), 128)), 128)
    grid = (pl.cdiv(B, tb),)

    def resident(a):
        # Constant index_map -> fetched once, VMEM-resident across all steps.
        return pl.BlockSpec(a.shape, lambda i: (0,) * a.ndim)

    itemsize = jnp.dtype(x.dtype).itemsize
    cost = pl.CostEstimate(
        flops=2 * B * (D * 64 + 64 * 32 + 32),
        transcendentals=B * (64 + 1),                        # tanh + sigmoid
        bytes_accessed=B * D * itemsize + B * 4
        + sum(int(a.size) * jnp.dtype(a.dtype).itemsize
              for a in (w1, b1, w2, b2, w3, b3)),
    )

    out = pl.pallas_call(
        mlp_kernel,
        out_shape=jax.ShapeDtypeStruct((1, B), jnp.float32),
        grid=grid,
        in_specs=[pl.BlockSpec((tb, D), lambda i: (i, 0)),    # x: tiled rows
                  resident(w1), resident(b1),
                  resident(w2), resident(b2),
                  resident(w3), resident(b3)],
        out_specs=pl.BlockSpec((1, tb), lambda i: (0, i)),    # lane-dense out
        compiler_params=pltpu.CompilerParams(
            dimension_semantics=("parallel",),
            vmem_limit_bytes=32 * 1024 * 1024),
        cost_estimate=cost,
    )(x, w1, b1, w2, b2, w3, b3)
    return out.reshape(B, 1)


def init_params(key, input_shape):
    """Deterministic init with exact PyTorch nn.Linear layouts/shapes."""
    ks = jax.random.split(key, 6)

    def lin(kw, kb, fan_in, fan_out):
        bound = 1.0 / jnp.sqrt(fan_in)
        w = jax.random.uniform(kw, (fan_out, fan_in), jnp.float32, -bound, bound)
        b = jax.random.uniform(kb, (fan_out,), jnp.float32, -bound, bound)
        return w, b

    w1, b1 = lin(ks[0], ks[1], input_shape, 64)
    w2, b2 = lin(ks[2], ks[3], 64, 32)
    w3, b3 = lin(ks[4], ks[5], 32, 1)
    return {"w1": w1, "b1": b1, "w2": w2, "b2": b2, "w3": w3, "b3": b3}


def reference_forward(x, params):
    """Plain-JAX reference (eval-mode dropout = identity)."""
    x = x.astype(jnp.float32)
    h1 = jnp.tanh(x @ params["w1"].T + params["b1"])
    h2 = jnp.maximum(h1 @ params["w2"].T + params["b2"], 0.0)
    return jax.nn.sigmoid(h2 @ params["w3"].T + params["b3"])


if __name__ == "__main__":
    key = jax.random.PRNGKey(0)
    k_x, k_p = jax.random.split(key)

    batch, input_shape = 250, 32       # B % 128 != 0 -> exercises ragged grid
    x = jax.random.normal(k_x, (batch, input_shape), jnp.float32)
    params = init_params(k_p, input_shape)

    # f32 path: tb = 128 -> 2 ragged grid steps, last block partial.
    out = jax.block_until_ready(neural_network_forward(x, params))
    ref = reference_forward(x, params)
    assert out.shape == (batch, 1)
    assert jnp.allclose(out, ref, atol=5e-5, rtol=1e-4), \
        float(jnp.max(jnp.abs(out - ref)))

    # bf16 path: x and w1/w2 feed the MXU as bf16, accumulation stays f32.
    x_bf16 = x.astype(jnp.bfloat16)
    out_bf = jax.block_until_ready(neural_network_forward(x_bf16, params))
    ref_bf = reference_forward(x_bf16.astype(jnp.float32), params)
    assert out_bf.shape == (batch, 1)
    assert jnp.allclose(out_bf, ref_bf, atol=2e-2), \
        float(jnp.max(jnp.abs(out_bf - ref_bf)))

    print("KERNEL_OK")
</pallas_src>

<mosaic_0001>
module attributes {stable_mosaic.version = 11 : i64} {
  func.func @mlp_kernel(%arg0: i32, %arg1: memref<128x32xf32, #tpu.memory_space<vmem>>, %arg2: memref<64x32xf32, #tpu.memory_space<vmem>>, %arg3: memref<64x1xf32, #tpu.memory_space<vmem>>, %arg4: memref<32x64xf32, #tpu.memory_space<vmem>>, %arg5: memref<32x1xf32, #tpu.memory_space<vmem>>, %arg6: memref<32x1xf32, #tpu.memory_space<vmem>>, %arg7: memref<1x1xf32, #tpu.memory_space<vmem>>, %arg8: memref<1x128xf32, #tpu.memory_space<vmem>>) attributes {dimension_semantics = [#tpu.dimension_semantics<parallel>], iteration_bounds = array<i64: 2>, scalar_prefetch = 0 : i64, scratch_operands = 0 : i64, tpu.core_type = #tpu.core_type<tc>, window_params = [{transform_indices = @transform_0, window_bounds = array<i64: 128, 32>}, {pipeline_mode = #tpu.pipeline_mode<synchronous>, transform_indices = @transform_1, window_bounds = array<i64: 64, 32>}, {pipeline_mode = #tpu.pipeline_mode<synchronous>, transform_indices = @transform_2, window_bounds = array<i64: 64, 1>}, {pipeline_mode = #tpu.pipeline_mode<synchronous>, transform_indices = @transform_3, window_bounds = array<i64: 32, 64>}, {pipeline_mode = #tpu.pipeline_mode<synchronous>, transform_indices = @transform_4, window_bounds = array<i64: 32, 1>}, {pipeline_mode = #tpu.pipeline_mode<synchronous>, transform_indices = @transform_5, window_bounds = array<i64: 32, 1>}, {pipeline_mode = #tpu.pipeline_mode<synchronous>, transform_indices = @transform_6, window_bounds = array<i64: 1, 1>}, {transform_indices = @transform_7, window_bounds = array<i64: 1, 128>}]} {
    %c0 = arith.constant 0 : index
    %c0_0 = arith.constant 0 : index
    %0 = vector.load %arg2[%c0, %c0_0] : memref<64x32xf32, #tpu.memory_space<vmem>>, vector<64x32xf32>
    %c0_1 = arith.constant 0 : index
    %c0_2 = arith.constant 0 : index
    %1 = vector.load %arg1[%c0_1, %c0_2] : memref<128x32xf32, #tpu.memory_space<vmem>>, vector<128x32xf32>
    %cst = arith.constant dense<0.000000e+00> : vector<64x128xf32>
    %2 = tpu.matmul %0, %1, %cst {dimension_numbers = #tpu.dot_dimension_numbers<[1], [1], [0], [0], [0, 0, 1, 0], [], []>} : vector<64x32xf32>, vector<128x32xf32>, vector<64x128xf32> -> vector<64x128xf32>
    %c0_3 = arith.constant 0 : index
    %c0_4 = arith.constant 0 : index
    %3 = vector.load %arg3[%c0_3, %c0_4] : memref<64x1xf32, #tpu.memory_space<vmem>>, vector<64x1xf32>
    %4 = vector.broadcast %3 : vector<64x1xf32> to vector<64x128xf32>
    %5 = arith.addf %2, %4 : vector<64x128xf32>
    %6 = math.tanh %5 : vector<64x128xf32>
    %c0_5 = arith.constant 0 : index
    %c0_6 = arith.constant 0 : index
    %7 = vector.load %arg4[%c0_5, %c0_6] : memref<32x64xf32, #tpu.memory_space<vmem>>, vector<32x64xf32>
    %cst_7 = arith.constant dense<0.000000e+00> : vector<32x128xf32>
    %8 = tpu.matmul %7, %6, %cst_7 {dimension_numbers = #tpu.dot_dimension_numbers<[1], [0], [0], [1], [0, 0, 1, 1], [], []>} : vector<32x64xf32>, vector<64x128xf32>, vector<32x128xf32> -> vector<32x128xf32>
    %c0_8 = arith.constant 0 : index
    %c0_9 = arith.constant 0 : index
    %9 = vector.load %arg5[%c0_8, %c0_9] : memref<32x1xf32, #tpu.memory_space<vmem>>, vector<32x1xf32>
    %10 = vector.broadcast %9 : vector<32x1xf32> to vector<32x128xf32>
    %11 = arith.addf %8, %10 : vector<32x128xf32>
    %cst_10 = arith.constant 0.000000e+00 : f32
    %12 = vector.broadcast %cst_10 : f32 to vector<32x128xf32>
    %13 = arith.maximumf %11, %12 : vector<32x128xf32>
    %c0_11 = arith.constant 0 : index
    %c0_12 = arith.constant 0 : index
    %14 = vector.load %arg6[%c0_11, %c0_12] : memref<32x1xf32, #tpu.memory_space<vmem>>, vector<32x1xf32>
    %15 = vector.broadcast %14 : vector<32x1xf32> to vector<32x128xf32>
    %16 = arith.mulf %13, %15 : vector<32x128xf32>
    %cst_13 = arith.constant dense<0.000000e+00> : vector<128xf32>
    %17 = vector.multi_reduction <add>, %16, %cst_13 [0] : vector<32x128xf32> to vector<128xf32>
    %18 = vector.shape_cast %17 : vector<128xf32> to vector<1x128xf32>
    %c0_14 = arith.constant 0 : index
    %c0_15 = arith.constant 0 : index
    %19 = vector.load %arg7[%c0_14, %c0_15] : memref<1x1xf32, #tpu.memory_space<vmem>>, vector<1x1xf32>
    %20 = vector.broadcast %19 : vector<1x1xf32> to vector<1x128xf32>
    %21 = arith.addf %18, %20 : vector<1x128xf32>
    %22 = arith.negf %21 : vector<1x128xf32>
    %23 = math.exp %22 : vector<1x128xf32>
    %cst_16 = arith.constant 1.000000e+00 : f32
    %24 = vector.broadcast %cst_16 : f32 to vector<1x128xf32>
    %25 = arith.addf %24, %23 : vector<1x128xf32>
    %26 = arith.divf %24, %25 : vector<1x128xf32>
    %c0_17 = arith.constant 0 : index
    %c0_18 = arith.constant 0 : index
    %27 = vector.load %arg8[%c0_17, %c0_18] : memref<1x128xf32, #tpu.memory_space<vmem>>, vector<1x128xf32>
    tpu.vector_store %arg8[%c0_17, %c0_18], %26 {strides = array<i32>} : memref<1x128xf32, #tpu.memory_space<vmem>>, vector<1x128xf32>,
    return
  }
  func.func @transform_0(%arg0: i32) -> (i32, i32) {
    %c0_i32 = arith.constant 0 : i32
    %c0_i32_0 = arith.constant 0 : i32
    return %arg0, %c0_i32 : i32, i32
  }
  func.func @transform_1(%arg0: i32) -> (i32, i32) {
    %c0_i32 = arith.constant 0 : i32
    %c0_i32_0 = arith.constant 0 : i32
    %c0_i32_1 = arith.constant 0 : i32
    return %c0_i32, %c0_i32_0 : i32, i32
  }
  func.func @transform_2(%arg0: i32) -> (i32, i32) {
    %c0_i32 = arith.constant 0 : i32
    %c0_i32_0 = arith.constant 0 : i32
    %c0_i32_1 = arith.constant 0 : i32
    return %c0_i32, %c0_i32_0 : i32, i32
  }
  func.func @transform_3(%arg0: i32) -> (i32, i32) {
    %c0_i32 = arith.constant 0 : i32
    %c0_i32_0 = arith.constant 0 : i32
    %c0_i32_1 = arith.constant 0 : i32
    return %c0_i32, %c0_i32_0 : i32, i32
  }
  func.func @transform_4(%arg0: i32) -> (i32, i32) {
    %c0_i32 = arith.constant 0 : i32
    %c0_i32_0 = arith.constant 0 : i32
    %c0_i32_1 = arith.constant 0 : i32
    return %c0_i32, %c0_i32_0 : i32, i32
  }
  func.func @transform_5(%arg0: i32) -> (i32, i32) {
    %c0_i32 = arith.constant 0 : i32
    %c0_i32_0 = arith.constant 0 : i32
    %c0_i32_1 = arith.constant 0 : i32
    return %c0_i32, %c0_i32_0 : i32, i32
  }
  func.func @transform_6(%arg0: i32) -> (i32, i32) {
    %c0_i32 = arith.constant 0 : i32
    %c0_i32_0 = arith.constant 0 : i32
    %c0_i32_1 = arith.constant 0 : i32
    return %c0_i32, %c0_i32_0 : i32, i32
  }
  func.func @transform_7(%arg0: i32) -> (i32, i32) {
    %c0_i32 = arith.constant 0 : i32
    %c0_i32_0 = arith.constant 0 : i32
    return %c0_i32, %arg0 : i32, i32
  }
}

</mosaic_0001>

<bundles_post_ra>
// kernel: tpu_custom_call.1
= control target key start
LH: loop header
LB: loop body
LE: loop exit
PB: predicated region body
PF: predicated region fallthrough
CT: control target
= control target key end

     0   :  { %s1417_s0 = inlined_call_operand.vmem [shape: f32[250,32], index: 0, kind: input, shape index: {}]   ;;  %s1418_s1 = inlined_call_operand.vmem [shape: f32[64,32], index: 1, kind: input, shape index: {}]   ;;  %s1419_s2 = inlined_call_operand.vmem [shape: f32[64,1], index: 2, kind: input, shape index: {}]   ;;  %s1420_s3 = inlined_call_operand.vmem [shape: f32[32,64], index: 3, kind: input, shape index: {}]   ;;  %s1421_s4 = inlined_call_operand.vmem [shape: f32[32,1], index: 4, kind: input, shape index: {}]   ;;  %s1422_s5 = inlined_call_operand.vmem [shape: f32[32,1], index: 5, kind: input, shape index: {}]   ;;  %s1423_s6 = inlined_call_operand.<no memory space> [shape: f32[1,1], index: 6, kind: input, shape index: {}]   ;;  %s1424_s7 = inlined_call_operand.hbm [shape: f32[1,250], index: 7, kind: output, shape index: {}]  }
   0x1   :  { %v12_v0 = vstv %s1423_s6 }
   0x2   :  { %13 = vst [vmem:[#allocation2] sm:$0x1] %v12_v0 }
   0x3   :  { %14 = vsyncpa [#allocation4], 0 }
   0x4   :  { %16 = vsyncpa [#allocation4 + $0x1], 0  ;;  %s1166_s26 = smov 0   ;;  %s1168_s27 = smov 0  }
   0x5   :  { %s1170_s28 = smov 0   ;;  %s1172_s29 = smov 0  }
   0x6 LB: > { %s790_s6 = sadd.s32 4294967295, %s1119_s29   ;;  %s791_s30 = sadd.s32 4294967294, %s1119_s29   ;;  %s1119_s29 = sphi %s1172_s29, %s1432_s29   ;;  %s1115_s28 = sphi %s1170_s28, %s1431_s28   ;;  %s1111_s27 = sphi %s1168_s27, %s1430_s27   ;;  %s1107_s26 = sphi %s1166_s26, %s1429_s26  }
   0x7   : > { %s1189_s8 = sadd.s32 1, %s1119_s29   ;;  %s181_s9 = sadd.s32 1, %s1115_s28 }
   0x8   : > { %s178_s10 = ssub.s32 %s1119_s29, %s1189_s8  ;;  %p191_p0 = scmp.ne.s32.totalorder %s1115_s28, %s1111_s27 }
   0x9   : > { %p179_p1 = scmp.eq.s32.totalorder %s178_s10, 0  ;;  %p192_p2 = scmp.eq.s32.totalorder %s790_s6, 1 }
   0xa   : > { %p197_p3 = scmp.ne.s32.totalorder %s1111_s27, %s1107_s26  ;;  %p198_p4 = scmp.eq.s32.totalorder %s791_s30, 1 }
   0xb   : > { %s1199_s11 = scalar_select %p179_p1, %s1115_s28, %s181_s9  }
   0xc   : > { %p1201_p5 = por %p192_p2, %p191_p0  ;;  %p1205_p6 = por %p198_p4, %p197_p3 }
   0xd   : > { %p794_p7 = scmp.ge.s32.totalorder %s1119_s29, 1  ;;  %p243_p8 = scmp.lt.s32.totalorder %s1119_s29, 3 }
   0xf   : > { %p244_p9 = pnand %p794_p7, %p243_p8 }
  0x10   : > { %s1211_s14 = sshll.u32 (!%p244_p9), %s790_s6, 4  ;;  %vm352_vm0 = vcmask (!%p244_p9), 261120   ;;  %v280_v1 = vld [vmem:[%s1418_s1] sm:$0xff] (!%p244_p9)  ;;  %v1121_v2 = vmov (!%p244_p9), 0   ;;  %v306_v4 = vld [vmem:[%s1419_s2 + $0x10] sm:$0xff] (!%p244_p9)  ;;  %v305_v5 = vld [vmem:[%s1419_s2 + $0x8] sm:$0xff] (!%p244_p9) }
  0x11   : > { %247 = sbr.rel (%p244_p9) target bundleno = 620 (0x26c), region = 48  ;;  %p275_p10 = scmp.lt.s32.totalorder (!%p244_p9), %s1211_s14, 31  ;;  %897 = vmatprep.mubr.msk.f32.mxu0 (!%p244_p9), %vm352_vm0, %v280_v1  ;;  %1035 = vset.pattern.permute.xlu0 (!%p244_p9), %v1121_v2  ;;  %v304_v3 = vld [vmem:[%s1419_s2] sm:$0xff] (!%p244_p9)  ;;  %v307_v6 = vld [vmem:[%s1419_s2 + $0x18] sm:$0xff] (!%p244_p9)  ;;  %vm1238_vm1 = vmpackc.low (!%p244_p9), %vm352_vm0, %vm352_vm0  ;;  %vm566_vm2 = vcmask (!%p244_p9), 523264  }
  0x12   : > { %1036 = vset.pattern.permute.xlu1 (!%p244_p9), %v1121_v2  ;;  %314 = vperm.xlu0 (!%p244_p9), %1035, %v304_v3   ;;  %v308_v14 = vld [vmem:[%s1419_s2 + $0x20] sm:$0xff] (!%p244_p9)  ;;  %v309_v15 = vld [vmem:[%s1419_s2 + $0x28] sm:$0xff] (!%p244_p9)  ;;  %v310_v18 = vld [vmem:[%s1419_s2 + $0x30] sm:$0xff] (!%p244_p9)  ;;  %s1122_s25 = smov (!%p244_p9), [#allocation3]  }
  0x13   : > { %324 = vperm.xlu1 (!%p244_p9), %1036, %v306_v4   ;;  %v311_v19 = vld [vmem:[%s1419_s2 + $0x38] sm:$0xff] (!%p244_p9)  ;;  %v542_v21 = vld [vmem:[%s1421_s4] sm:$0xff] (!%p244_p9)  ;;  %v543_v22 = vld [vmem:[%s1421_s4 + $0x8] sm:$0xff] (!%p244_p9)  ;;  %s1061_s6 = sshll.u32 (!%p244_p9), %s1122_s25, 4  ;;  %s1062_s6 = int_to_ptr.vmem [resolvable:$false] %s1061_s6 }
  0x14   : > { %v544_v25 = vld [vmem:[%s1421_s4 + $0x10] sm:$0xff] (!%p244_p9)  ;;  %v545_v26 = vld [vmem:[%s1421_s4 + $0x18] sm:$0xff] (!%p244_p9)  ;;  %v668_v28 = vld [vmem:[%s1422_s5] sm:$0xff] (!%p244_p9)  ;;  %s1063_s30 = scalar_lea.vmem (!%p244_p9), %s1062_s6, 32 }
  0x15   : > { %v669_v29 = vld [vmem:[%s1422_s5 + $0x8] sm:$0xff] (!%p244_p9)  ;;  %v670_v32 = vld [vmem:[%s1422_s5 + $0x10] sm:$0xff] (!%p244_p9)  ;;  %v671_v33 = vld [vmem:[%s1422_s5 + $0x18] sm:$0xff] (!%p244_p9) }
  0x16   : > { %319 = vperm.xlu0 (!%p244_p9), %1035, %v305_v5   ;;  %v705_v35 = vld [vmem:[#allocation2] sm:$0x1] (!%p244_p9)  ;;  %v281_v45 = vld [vmem:[%s1418_s1 + $0x8] sm:$0xff] (!%p244_p9)  ;;  %v282_v46 = vld [vmem:[%s1418_s1 + $0x10] sm:$0xff] (!%p244_p9) }
  0x17   : > { %329 = vperm.xlu1 (!%p244_p9), %1036, %v307_v6   ;;  %v283_v47 = vld [vmem:[%s1418_s1 + $0x18] sm:$0xff] (!%p244_p9)  ;;  %v284_v48 = vld [vmem:[%s1418_s1 + $0x20] sm:$0xff] (!%p244_p9)  ;;  %v285_v49 = vld [vmem:[%s1418_s1 + $0x28] sm:$0xff] (!%p244_p9) }
  0x18   : > { %s276_s17 = scalar_select %p275_p10, %s1211_s14, 31  ;;  %v286_v50 = vld [vmem:[%s1418_s1 + $0x30] sm:$0xff]  ;;  %v287_v51 = vld [vmem:[%s1418_s1 + $0x38] sm:$0xff]  ;;  %v538_v52 = vld [vmem:[%s1420_s3] sm:$0xff] }
  0x19   : > { %925 = vmatprep.mubr.msk.f32.mxu1 %vm566_vm2, %v538_v52 }
  0x1a   : > { %s796_s22 = sshll.u32 %s276_s17, 3  ;;  %334 = vperm.xlu0 %1035, %v308_v14   ;;  %s272_s17 = sand.u32 1, %s1111_s27  }
  0x1b   : > { %s1234_s10 = scalar_lea.vmem %s1417_s0, %s796_s22  ;;  %339 = vperm.xlu1 %1036, %v309_v15   ;;  %s273_s18 = scalar_lea.vmem [#allocation3], %s272_s17 }
  0x1c   : > { %v288_v8 = vld [vmem:[%s1234_s10] sm:$0xff]  ;;  %v289_v9 = vld [vmem:[%s1234_s10 + $0x8] sm:$0xff]  ;;  %v290_v10 = vld [vmem:[%s1234_s10 + $0x10] sm:$0xff]  ;;  %s736_s19 = sshll.u32 %s273_s18, 4  ;;  %s1375_s22 = scalar_lea.hbm %s1424_s7, %s1211_s14  ;;  %s1377_s19 = int_to_ptr.vmem [resolvable:$true] %s736_s19 }
  0x1d   : > { %v931_v11 = vpack.c.bf16 %v289_v9, %v288_v8  ;;  %v291_v12 = vld [vmem:[%s1234_s10 + $0x18] sm:$0xff]  ;;  %v292_v16 = vld [vmem:[%s1234_s10 + $0x20] sm:$0xff]  ;;  %v293_v17 = vld [vmem:[%s1234_s10 + $0x28] sm:$0xff]  ;;  %s724_s23 = scalar_lea.sflag [#allocation4], %s272_s17  ;;  %s1057_s24 = scalar_lea.vmem %s1377_s19, 16 }
  0x1e   : > { %v937_v13 = vpack.c.bf16 %v291_v12, %v290_v10  ;;  %v943_v20 = vpack.c.bf16 %v293_v17, %v292_v16  ;;  %344 = vperm.xlu0 %1035, %v310_v18   ;;  %v294_v23 = vld [vmem:[%s1234_s10 + $0x30] sm:$0xff]  ;;  %v295_v24 = vld [vmem:[%s1234_s10 + $0x38] sm:$0xff]  ;;  %v296_v30 = vld [vmem:[%s1234_s10 + $0x40] sm:$0xff]  ;;  %p1058_p11 = scmp.ne.s32.totalorder %s1377_s19, %s1057_s24  ;;  %p1064_p0 = scmp.lt.s32.totalorder %s1377_s19, %s1062_s6 }
  0x1f   : > { %933 = vmatprep.subr.msk.bf16.mxu0 %vm1238_vm1, %v931_v11  ;;  %349 = vperm.xlu1 %1036, %v311_v19   ;;  %v949_v27 = vpack.c.bf16 %v295_v24, %v294_v23  ;;  %v297_v31 = vld [vmem:[%s1234_s10 + $0x48] sm:$0xff]  ;;  %v298_v36 = vld [vmem:[%s1234_s10 + $0x50] sm:$0xff]  ;;  %v299_v37 = vld [vmem:[%s1234_s10 + $0x58] sm:$0xff]  ;;  %p1065_p1 = scmp.lt.s32.totalorder %s1063_s30, %s1057_s24 }
  0x20   : > { %936 = vmatpush3.bf16.xpose.msk.msra.mxu0 %vm1238_vm1, %v931_v11  ;;  %v955_v34 = vpack.c.bf16 %v297_v31, %v296_v30  ;;  %v961_v38 = vpack.c.bf16 %v299_v37, %v298_v36  ;;  %v300_v39 = vld [vmem:[%s1234_s10 + $0x60] sm:$0xff]  ;;  %v301_v40 = vld [vmem:[%s1234_s10 + $0x68] sm:$0xff]  ;;  %v302_v42 = vld [vmem:[%s1234_s10 + $0x70] sm:$0xff]  ;;  %p1059_p12 = pnand %p1058_p11, %p1201_p5 }
  0x21   : > { %939 = vmatprep.subr.msk.bf16.mxu0 %vm1238_vm1, %v937_v13  ;;  %v967_v41 = vpack.c.bf16 %v301_v40, %v300_v39  ;;  %v303_v43 = vld [vmem:[%s1234_s10 + $0x78] sm:$0xff]  ;;  %p1066_p2 = por %p1065_p1, %p1064_p0 }
  0x22   : > { %548 = vperm.xlu0 %1035, %v542_v21   ;;  %v973_v44 = vpack.c.bf16 %v303_v43, %v302_v42  ;;  %p1060_p13 = pneg %p1059_p12 }
  0x23   : > { %553 = vperm.xlu1 %1036, %v543_v22  }
  0x24   : > { %p1067_p3 = pnand %p1066_p2, %p1060_p13 }
  0x26   : > { %558 = vperm.xlu0 %1035, %v544_v25   ;;  %v539_v25 = vld [vmem:[%s1420_s3 + $0x8] sm:$0xff] }
  0x27   : > { %563 = vperm.xlu1 %1036, %v545_v26   ;;  %v540_v26 = vld [vmem:[%s1420_s3 + $0x10] sm:$0xff] }
  0x28   : > { %942 = vmatpush3.bf16.xpose.msk.msra.mxu0 %vm1238_vm1, %v937_v13 }
  0x29   : > { %945 = vmatprep.subr.msk.bf16.mxu0 %vm1238_vm1, %v943_v20 }
  0x2a   : > { %674 = vperm.xlu0 %1035, %v668_v28  }
  0x2b   : > { %679 = vperm.xlu1 %1036, %v669_v29  }
  0x2e   : > { %684 = vperm.xlu0 %1035, %v670_v32  }
  0x2f   : > { %689 = vperm.xlu1 %1036, %v671_v33  }
  0x30   : > { %948 = vmatpush3.bf16.xpose.msk.msra.mxu0 %vm1238_vm1, %v943_v20 }
  0x31   : > { %951 = vmatprep.subr.msk.bf16.mxu0 %vm1238_vm1, %v949_v27 }
  0x32   : > { %708 = vperm.xlu0 %1035, %v705_v35  }
  0x38   : > { %954 = vmatpush3.bf16.xpose.msk.msra.mxu0 %vm1238_vm1, %v949_v27  ;;  %v541_v27 = vld [vmem:[%s1420_s3 + $0x18] sm:$0xff] }
  0x39   : > { %957 = vmatprep.subr.msk.bf16.mxu0 %vm1238_vm1, %v955_v34 }
  0x40   : > { %960 = vmatpush3.bf16.xpose.msk.msra.mxu0 %vm1238_vm1, %v955_v34 }
  0x41   : > { %963 = vmatprep.subr.msk.bf16.mxu0 %vm1238_vm1, %v961_v38 }
  0x48   : > { %966 = vmatpush3.bf16.xpose.msk.msra.mxu0 %vm1238_vm1, %v961_v38 }
  0x49   : > { %969 = vmatprep.subr.msk.bf16.mxu0 %vm1238_vm1, %v967_v41 }
  0x50   : > { %972 = vmatpush3.bf16.xpose.msk.msra.mxu0 %vm1238_vm1, %v967_v41 }
  0x51   : > { %975 = vmatprep.subr.msk.bf16.mxu0 %vm1238_vm1, %v973_v44 }
  0x58   : > { %978 = vmatpush3.bf16.xpose.msk.msra.mxu0 %vm1238_vm1, %v973_v44 }
  0x5f   : > { %898 = vmatmul.mubr.msk.f32.vlgmr.msra.gmra.mrb[0].mxu0 %vm352_vm0, %v281_v45 }
  0x60   : > { %900 = vmatprep.mubr.msk.f32.mxu0 %vm352_vm0, %v282_v46 }
  0x63   : > { %901 = vmatmul.mubr.msk.f32.gmra.mrb[2].mxu0 %vm352_vm0, %v283_v47 }
  0x64   : > { %903 = vmatprep.mubr.msk.f32.mxu0 %vm352_vm0, %v284_v48 }
  0x67   : > { %904 = vmatmul.mubr.msk.f32.gmra.mrb[4].mxu0 %vm352_vm0, %v285_v49 }
  0x68   : > { %906 = vmatprep.mubr.msk.f32.mxu0 %vm352_vm0, %v286_v50 }
  0x6b   : > { %907 = vmatmul.mubr.msk.f32.gmra.mrb[6].mxu0 %vm352_vm0, %v287_v51 }
  0x91   : > { %v315_v53 = vpop.permute.xlu0 %314 }
  0x92   : > { %v325_v54 = vpop.permute.xlu1 %324 }
  0x95   : > { %v320_v55 = vpop.permute.xlu0 %319 }
  0x96   : > { %v330_v56 = vpop.permute.xlu1 %329 }
  0x99   : > { %v335_v2 = vpop.permute.xlu0 %334 }
  0x9a   : > { %v340_v0 = vpop.permute.xlu1 %339 }
  0x9d   : > { %v345_v10 = vpop.permute.xlu0 %344 }
  0x9e   : > { %v350_v7 = vpop.permute.xlu1 %349 }
  0xa1   : > { %v549_v28 = vpop.permute.xlu0 %548 }
  0xa2   : > { %v554_v29 = vpop.permute.xlu1 %553 }
  0xa5   : > { %v559_v30 = vpop.permute.xlu0 %558 }
  0xa6   : > { %v564_v31 = vpop.permute.xlu1 %563 }
  0xa9   : > { %v675_v36 = vpop.permute.xlu0 %674 }
  0xaa   : > { %v680_v38 = vpop.permute.xlu1 %679 }
  0xad   : > { %v685_v49 = vpop.permute.xlu0 %684 }
  0xae   : > { %v690_v51 = vpop.permute.xlu1 %689 }
 0x132   : > { %v899_v57 = vpop.f32.mrb[0].mxu0 }
 0x133   : > { %v497_v58 = vadd.f32 %v899_v57, %v320_v55  ;;  %v491_v59 = vpop.f32.mrb[1].mxu0 }
 0x134   : > { %v492_v60 = vadd.f32 %v491_v59, %v315_v53 }
 0x135   : > { %1037 = vtanh.f32 %v497_v58 }
 0x136   : > { %1039 = vtanh.f32 %v492_v60  ;;  %v902_v61 = vpop.f32.mrb[2].mxu0 }
 0x137   : > { %v507_v62 = vadd.f32 %v902_v61, %v330_v56  ;;  %v501_v63 = vpop.f32.mrb[3].mxu0 }
 0x138   : > { %v502_v1 = vadd.f32 %v501_v63, %v325_v54  ;;  %v711_v54 = vlaneseq }
 0x139   : > { %1041 = vtanh.f32 %v507_v62  ;;  %v709_v62 = vpop.permute.xlu0 %708 }
 0x13a   : > { %1043 = vtanh.f32 %v502_v1  ;;  %v905_v3 = vpop.f32.mrb[4].mxu0  ;;  %v712_v57 = vshrl.u32 %v711_v54, 7 }
 0x13b   : > { %v517_v4 = vadd.f32 %v905_v3, %v340_v0  ;;  %v511_v5 = vpop.f32.mrb[5].mxu0 }
 0x13c   : > { %v512_v6 = vadd.f32 %v511_v5, %v335_v2  ;;  %v713_v60 = vsub.s32 0, %v712_v57 }
 0x13d   : > { %1045 = vtanh.f32 %v517_v4 }
 0x13e   : > { %1047 = vtanh.f32 %v512_v6  ;;  %v908_v8 = vpop.f32.mrb[6].mxu0  ;;  %v714_v0 = vrot.slane %v709_v62, %v713_v60 }
 0x13f   : > { %v1038_v9 = vpop.eup %1037  ;;  %v527_v11 = vadd.f32 %v908_v8, %v350_v7  ;;  %v521_v12 = vpop.f32.mrb[7].mxu0 }
 0x140   : > { %v1040_v13 = vpop.eup %1039  ;;  %v522_v14 = vadd.f32 %v521_v12, %v345_v10 }
 0x141   : > { %1049 = vtanh.f32 %v527_v11  ;;  %v979_v15 = vpack.c.bf16 %v1038_v9, %v1040_v13 }
 0x142   : > { %1051 = vtanh.f32 %v522_v14 }
 0x143   : > { %v1042_v16 = vpop.eup %1041  ;;  %980 = vmatprep.subr.bf16.mxu1 %v979_v15 }
 0x144   : > { %v1044_v17 = vpop.eup %1043  ;;  %982 = vmatpush3.bf16.msra.mxu1 %v979_v15 }
 0x145   : > { %v983_v18 = vpack.c.bf16 %v1042_v16, %v1044_v17 }
 0x147   : > { %v1046_v19 = vpop.eup %1045  ;;  %984 = vmatprep.subr.bf16.mxu1 %v983_v18 }
 0x148   : > { %v1048_v20 = vpop.eup %1047  ;;  %986 = vmatpush3.bf16.msra.mxu1 %v983_v18 }
 0x149   : > { %v987_v21 = vpack.c.bf16 %v1046_v19, %v1048_v20 }
 0x14b   : > { %v1050_v22 = vpop.eup %1049  ;;  %988 = vmatprep.subr.bf16.mxu1 %v987_v21 }
 0x14c   : > { %v1052_v23 = vpop.eup %1051  ;;  %990 = vmatpush3.bf16.msra.mxu1 %v987_v21 }
 0x14d   : > { %v991_v24 = vpack.c.bf16 %v1050_v22, %v1052_v23 }
 0x14f   : > { %992 = vmatprep.subr.bf16.mxu1 %v991_v24 }
 0x150   : > { %994 = vmatpush3.bf16.msra.mxu1 %v991_v24 }
 0x153   : > { %926 = vmatmul.mubr.msk.f32.vlgmr.msra.gmra.mrb[0].mxu1 %vm566_vm2, %v539_v25 }
 0x154   : > { %928 = vmatprep.mubr.msk.f32.mxu1 %vm566_vm2, %v540_v26 }
 0x157   : > { %929 = vmatmul.mubr.msk.f32.gmra.mrb[2].mxu1 %vm566_vm2, %v541_v27 }
 0x226   : > { %v927_v32 = vpop.f32.mrb[0].mxu1 }
 0x227   : > { %v651_v33 = vadd.f32 %v927_v32, %v554_v29  ;;  %v645_v34 = vpop.f32.mrb[1].mxu1 }
 0x228   : > { %v646_v35 = vadd.f32 %v645_v34, %v549_v28 }
 0x229   : > { %v665_v37 = vmax.f32 %v651_v33, 0.0 }
 0x22a   : > { %v664_v39 = vmax.f32 %v646_v35, 0.0  ;;  %v930_v40 = vpop.f32.mrb[2].mxu1 }
 0x22b   : > { %v693_v41 = vmul.f32 %v680_v38, %v665_v37  ;;  %v661_v42 = vadd.f32 %v930_v40, %v564_v31  ;;  %v655_v43 = vpop.f32.mrb[3].mxu1 }
 0x22c   : > { %v692_v44 = vmul.f32 %v675_v36, %v664_v39  ;;  %v656_v45 = vadd.f32 %v655_v43, %v559_v30 }
 0x22d   : > { %v667_v47 = vmax.f32 %v661_v42, 0.0 }
 0x22e   : > { %v696_v46 = vadd.f32 %v693_v41, %v692_v44  ;;  %v666_v48 = vmax.f32 %v656_v45, 0.0 }
 0x22f   : > { %v695_v52 = vmul.f32 %v690_v51, %v667_v47 }
 0x230   : > { %v694_v50 = vmul.f32 %v685_v49, %v666_v48 }
 0x232   : > { %v697_v53 = vadd.f32 %v696_v46, %v694_v50 }
 0x234   : > { %v698_v55 = vadd.f32 %v697_v53, %v695_v52 }
 0x236   : > { %v699_v56 = vrot.slane %v698_v55, 4 }
 0x238   : > { %v700_v58 = vadd.f32 %v699_v56, %v698_v55 }
 0x23a   : > { %v701_v59 = vrot.slane %v700_v58, 2 }
 0x23c   : > { %v702_v61 = vadd.f32 %v701_v59, %v700_v58 }
 0x23e   : > { %v703_v63 = vrot.slane %v702_v61, 1 }
 0x240   : > { %v704_v1 = vadd.f32 %v703_v63, %v702_v61 }
 0x242   : > { %v715_v2 = vadd.f32 %v714_v0, %v704_v1 }
 0x244   : > { %v825_v3 = vmul.f32 -1.442695, %v715_v2 }
 0x246   : > { %1053 = vpow2.f32 %v825_v3 }
 0x250   : > { %v1054_v4 = vpop.eup %1053 }
 0x251   : > { %v719_v5 = vadd.f32 1.0, %v1054_v4 }
 0x253   : > { %1055 = vrcp.f32 %v719_v5 }
 0x25d   : > { %v1056_v6 = vpop.eup %1055 }
 0x25e   : > { %722 = vst [vmem:[%s273_s18] sm:$0x1] %v1056_v6 }
 0x25f   : > { %1070 = shalt.err (!%p1067_p3)
}
 0x260   : > { %s1071_s14 = scalar_lea.hbm %s1375_s22, 16  ;;  %s1075_s15 = scalar_lea.hbm %s1424_s7, 32 }
 0x261   : > { %p1072_p4 = scmp.ne.s32.totalorder %s1375_s22, %s1071_s14  ;;  %p1076_p9 = scmp.lt.u32.totalorder %s1375_s22, %s1424_s7 }
 0x262   : > { %p1077_p10 = scmp.lt.u32.totalorder %s1075_s15, %s1071_s14  ;;  %p1079_p12 = scmp.lt.u32.totalorder %s1071_s14, %s1375_s22 }
 0x263   : > { %p1073_p7 = pnand %p1072_p4, %p1201_p5 }
 0x264   : > { %p1078_p11 = por %p1077_p10, %p1076_p9 }
 0x265   : > { %p1074_p8 = pneg %p1073_p7 }
 0x266   : > { %p1080_p13 = por %p1079_p12, %p1078_p11 }
 0x268   : > { %p1081_p0 = pnand %p1080_p13, %p1074_p8 }
 0x26a   : > { %1084 = shalt.err (!%p1081_p0)
}
 0x26b   : > { %995 = dma.vmem_to_hbm [thread:$0]  (%p1201_p5), %s1377_s19, 16, %s1375_s22, %s724_s23  }
 0x26c PF: > { %p1001_p1 = scmp.ge.s32.totalorder %s1119_s29, 2  ;;  %s748_s18 = sand.u32 1, %s1107_s26  }
 0x26d   : > { %s749_s20 = scalar_lea.sflag [#allocation4], %s748_s18 }
 0x26e   : > { %p998_p2 = pnand %p1001_p1, %p1205_p6 }
 0x270   : > { %1102 = dma.done.wait (!%p998_p2), %s749_s20, 16  }
 0x271   : > { %1104 = vsyncadd (!%p998_p2), %s749_s20, 4294967280  ;;  %p19_p3 = scmp.ge.s32.totalorder %s1189_s8, 4   ;;  %s1429_s26 = smov %s1111_s27 }
 0x272   : > { %s1430_s27 = smov %s1115_s28  ;;  %s1431_s28 = smov %s1199_s11 }
 0x273   : > { %s1432_s29 = smov %s1189_s8  ;;  %21 = sbr.rel (!%p19_p3) target bundleno = 6 (0x6), region = 83 }
 0x27a   :  { %753 = vsyncpa [#allocation4], 1 }
 0x27b   :  { %755 = vsyncpa [#allocation4 + $0x1], 1 }

</bundles_post_ra>
